<compile_context>
chip_gen: v7x
topology: tpu7x:2x2x1
jax: 0.10.0
libtpu: 0.0.40
codegen_flags: <defaults>
</compile_context>

<pallas_src>
import functools

import jax
import jax.numpy as jnp
from jax.experimental import pallas as pl
from jax.experimental.pallas import tpu as pltpu


# ----------------------------- helpers --------------------------------------


def _round_up(x, m):
    return (x + m - 1) // m * m


def _vmem_capacity_bytes():
    """Trace-time, generation-aware VMEM capacity query with a safe fallback."""
    try:
        cap = getattr(pltpu.get_tpu_info(), "vmem_capacity_bytes", None)
        if cap:
            return int(cap)
    except Exception:
        pass
    return 64 * 1024 * 1024  # conservative: v7x per-TensorCore physical VMEM


def _choose_batch_tile(B, F, O_pad, vmem_limit, k_tile_bytes):
    """Largest TB (multiple of 8, <=2048) whose live buffers fit the budget.

    Live VMEM ~= 2*(TB*F)*4 [x double-buffer] + 2*(TB*O_pad)*4 [out double-buffer]
               + k_tile_bytes [weights/bias buffers (+accumulator in K-tiled path)].
    """
    per_row = 2 * (F + O_pad) * 4
    tb = max((vmem_limit - k_tile_bytes) // per_row, 8)
    tb = min(tb, 2048)                      # per-grid-step overhead amortized here
    tb = min(tb, _round_up(B, 8))           # never exceed the (sublane-rounded) batch
    if B >= 16:
        # Guarantee >= 2 grid steps so v7x's 2nd TensorCore splits the batch axis.
        tb = min(tb, _round_up(pl.cdiv(B, 2), 8))
    return max((tb // 8) * 8, 8)


# ----------------------------- kernels --------------------------------------


def fused_linear_kernel(x_ref, wc_ref, bc_ref, o_ref):
    # One MXU matmul per batch tile: (TB, F) @ (F, 128) + (1, 128).
    y = jnp.dot(x_ref[...], wc_ref[...], preferred_element_type=jnp.float32)
    o_ref[...] = (y + bc_ref[...]).astype(o_ref.dtype)


def fused_linear_ktiled_kernel(x_ref, wc_ref, bc_ref, o_ref, acc_ref):
    # Fallback for very large F: reduce over K tiles into an f32 accumulator.
    k = pl.program_id(1)

    @pl.when(k == 0)
    def _():
        acc_ref[...] = jnp.zeros_like(acc_ref)

    acc_ref[...] += jnp.dot(x_ref[...], wc_ref[...],
                            preferred_element_type=jnp.float32)

    @pl.when(k == pl.num_programs(1) - 1)
    def _():
        o_ref[...] = (acc_ref[...] + bc_ref[...]).astype(o_ref.dtype)


# ----------------------------- wrapper --------------------------------------


@functools.partial(jax.jit, static_argnames=("trim_output",))
def generic_linear_model(x, w1, b1, w2, b2, *, trim_output=True):
    """x: (B, in_size, in_size) float32 -> logits (B, 10).

    Equivalent to PyTorch: Linear(F, 200) -> Linear(200, 10) applied to
    x.view(-1, F), with JAX weights stored as (in_features, out_features).
    With trim_output=False returns the lane-dense (B, 128) slab (cols 10..127
    are exactly 0) to avoid an extra HBM pass for the slice.
    """
    F = w1.shape[0]
    O = w2.shape[1]

    # --- param prep (once, outside the kernel) -------------------------------
    # y = (x @ W1 + b1) @ W2 + b2 = x @ (W1 @ W2) + (b1 @ W2 + b2)
    wc = jnp.dot(w1, w2, preferred_element_type=jnp.float32)            # (F, O)
    bc = jnp.dot(b1, w2, preferred_element_type=jnp.float32) + b2       # (O,)

    O_pad = _round_up(max(O, 1), 128)          # lane-dense output (unmasked vst)
    bc_pad = jnp.zeros((1, O_pad), jnp.float32).at[:, :O].set(bc.reshape(1, O))

    # --- input prep (flatten stays in plain JAX; no batch padding) ----------
    x_flat = x.reshape(-1, F).astype(jnp.float32)   # matches view(-1, in*in)
    B = x_flat.shape[0]

    # --- generation-aware VMEM budgeting -------------------------------------
    vmem_limit = min(int(_vmem_capacity_bytes() * 0.8), 100 * 1024 * 1024)

    resident_weight_bytes = 2 * (F * O_pad + O_pad) * 4   # double-buffered blocks
    weights_fit = resident_weight_bytes <= vmem_limit // 2

    if weights_fit:
        # ---- main path: fused weight resident in VMEM across all batch tiles
        wc_pad = jnp.zeros((F, O_pad), jnp.float32).at[:, :O].set(wc)
        TB = _choose_batch_tile(B, F, O_pad, vmem_limit, resident_weight_bytes)
        grid = (pl.cdiv(B, TB),)               # ragged last block handled by Pallas

        out_pad = pl.pallas_call(
            fused_linear_kernel,
            out_shape=jax.ShapeDtypeStruct((B, O_pad), jnp.float32),
            grid=grid,
            in_specs=[
                pl.BlockSpec((TB, F), lambda i: (i, 0)),        # streamed
                pl.BlockSpec((F, O_pad), lambda i: (0, 0)),     # VMEM-resident
                pl.BlockSpec((1, O_pad), lambda i: (0, 0)),     # VMEM-resident
            ],
            out_specs=pl.BlockSpec((TB, O_pad), lambda i: (i, 0)),
            compiler_params=pltpu.CompilerParams(
                dimension_semantics=("parallel",),
                vmem_limit_bytes=vmem_limit,
            ),
        )(x_flat, wc_pad, bc_pad)
    else:
        # ---- fallback: K-tiled reduction over F (very large in_size; protects
        # v7x's 64 MiB VMEM from spill/OOM).  Pads F to a multiple of TK so the
        # final K block never mixes unspecified data into the accumulator.
        TK = 4096
        F_pad = _round_up(F, TK)
        x_k = jnp.zeros((B, F_pad), jnp.float32).at[:, :F].set(x_flat)
        wc_k = jnp.zeros((F_pad, O_pad), jnp.float32).at[:F, :O].set(wc)

        k_tile_bytes = 2 * (TK * O_pad + O_pad) * 4 + 0  # weight/bias buffers
        # accumulator adds TB*O_pad*4; fold it into per-row budgeting:
        per_row = (2 * TK + 3 * O_pad) * 4
        TB = max((vmem_limit - k_tile_bytes) // per_row, 8)
        TB = min(TB, 2048, _round_up(B, 8))
        if B >= 16:
            TB = min(TB, _round_up(pl.cdiv(B, 2), 8))
        TB = max((TB // 8) * 8, 8)

        grid = (pl.cdiv(B, TB), F_pad // TK)
        out_pad = pl.pallas_call(
            fused_linear_ktiled_kernel,
            out_shape=jax.ShapeDtypeStruct((B, O_pad), jnp.float32),
            grid=grid,
            in_specs=[
                pl.BlockSpec((TB, TK), lambda i, k: (i, k)),
                pl.BlockSpec((TK, O_pad), lambda i, k: (k, 0)),
                pl.BlockSpec((1, O_pad), lambda i, k: (0, 0)),
            ],
            out_specs=pl.BlockSpec((TB, O_pad), lambda i, k: (i, 0)),
            scratch_shapes=[pltpu.VMEM((TB, O_pad), jnp.float32)],
            compiler_params=pltpu.CompilerParams(
                dimension_semantics=("parallel", "arbitrary"),
                vmem_limit_bytes=vmem_limit,
            ),
        )(x_k, wc_k, bc_pad)

    if not trim_output:
        return out_pad          # (B, 128); columns O..127 are exactly 0
    # Inside this jit (or a larger consumer jit) XLA can fuse this slice; the
    # in-kernel store stays lane-dense either way.
    return out_pad[:, :O]


# ----------------------------- params & test --------------------------------


def init_params(in_size, key):
    """Deterministic init matching nn.Linear(in*in, 200) -> nn.Linear(200, 10)."""
    F = in_size * in_size
    k1, k2, k3, k4 = jax.random.split(key, 4)
    bound1 = 1.0 / jnp.sqrt(F)
    bound2 = 1.0 / jnp.sqrt(200.0)
    w1 = jax.random.uniform(k1, (F, 200), jnp.float32, -bound1, bound1)
    b1 = jax.random.uniform(k2, (200,), jnp.float32, -bound1, bound1)
    w2 = jax.random.uniform(k3, (200, 10), jnp.float32, -bound2, bound2)
    b2 = jax.random.uniform(k4, (10,), jnp.float32, -bound2, bound2)
    return w1, b1, w2, b2


if __name__ == "__main__":
    in_size = 16
    batch = 2
    key = jax.random.PRNGKey(0)
    kx, kp = jax.random.split(key)
    x = jax.random.normal(kx, (batch, in_size, in_size), jnp.float32)
    w1, b1, w2, b2 = init_params(in_size, kp)

    out = generic_linear_model(x, w1, b1, w2, b2)
    out = jax.block_until_ready(out)

    # reference check in plain JAX (unfused two-layer form)
    ref = x.reshape(batch, -1) @ w1 + b1
    ref = ref @ w2 + b2
    assert out.shape == (batch, 10)
    # W1@W2 fusion reassociates float sums -> tiny drift vs the unfused reference
    assert jnp.allclose(out, ref, atol=1e-4, rtol=1e-4)
    print("KERNEL_OK")
</pallas_src>

<mosaic_0001>
module attributes {stable_mosaic.version = 11 : i64} {
  func.func @fused_linear_kernel(%arg0: i32, %arg1: memref<8x256xf32, #tpu.memory_space<vmem>>, %arg2: memref<256x128xf32, #tpu.memory_space<vmem>>, %arg3: memref<1x128xf32, #tpu.memory_space<vmem>>, %arg4: memref<8x128xf32, #tpu.memory_space<vmem>>) attributes {dimension_semantics = [#tpu.dimension_semantics<parallel>], iteration_bounds = array<i64: 1>, scalar_prefetch = 0 : i64, scratch_operands = 0 : i64, tpu.core_type = #tpu.core_type<tc>, window_params = [{transform_indices = @transform_0, window_bounds = array<i64: 8, 256>}, {pipeline_mode = #tpu.pipeline_mode<synchronous>, transform_indices = @transform_1, window_bounds = array<i64: 256, 128>}, {pipeline_mode = #tpu.pipeline_mode<synchronous>, transform_indices = @transform_2, window_bounds = array<i64: 1, 128>}, {transform_indices = @transform_3, window_bounds = array<i64: 8, 128>}]} {
    %c0 = arith.constant 0 : index
    %c0_0 = arith.constant 0 : index
    %0 = vector.load %arg1[%c0, %c0_0] : memref<8x256xf32, #tpu.memory_space<vmem>>, vector<8x256xf32>
    %c0_1 = arith.constant 0 : index
    %c0_2 = arith.constant 0 : index
    %1 = vector.load %arg2[%c0_1, %c0_2] : memref<256x128xf32, #tpu.memory_space<vmem>>, vector<256x128xf32>
    %cst = arith.constant dense<0.000000e+00> : vector<8x128xf32>
    %2 = tpu.matmul %0, %1, %cst {dimension_numbers = #tpu.dot_dimension_numbers<[1], [0], [0], [1], [0, 0, 1, 1], [], []>} : vector<8x256xf32>, vector<256x128xf32>, vector<8x128xf32> -> vector<8x128xf32>
    %c0_3 = arith.constant 0 : index
    %c0_4 = arith.constant 0 : index
    %3 = vector.load %arg3[%c0_3, %c0_4] : memref<1x128xf32, #tpu.memory_space<vmem>>, vector<1x128xf32>
    %4 = vector.broadcast %3 : vector<1x128xf32> to vector<8x128xf32>
    %5 = arith.addf %2, %4 : vector<8x128xf32>
    %c0_5 = arith.constant 0 : index
    %c0_6 = arith.constant 0 : index
    %6 = vector.load %arg4[%c0_5, %c0_6] : memref<8x128xf32, #tpu.memory_space<vmem>>, vector<8x128xf32>
    tpu.vector_store %arg4[%c0_5, %c0_6], %5 {strides = array<i32>} : memref<8x128xf32, #tpu.memory_space<vmem>>, vector<8x128xf32>,
    return
  }
  func.func @transform_0(%arg0: i32) -> (i32, i32) {
    %c0_i32 = arith.constant 0 : i32
    %c0_i32_0 = arith.constant 0 : i32
    return %arg0, %c0_i32 : i32, i32
  }
  func.func @transform_1(%arg0: i32) -> (i32, i32) {
    %c0_i32 = arith.constant 0 : i32
    %c0_i32_0 = arith.constant 0 : i32
    %c0_i32_1 = arith.constant 0 : i32
    return %c0_i32, %c0_i32_0 : i32, i32
  }
  func.func @transform_2(%arg0: i32) -> (i32, i32) {
    %c0_i32 = arith.constant 0 : i32
    %c0_i32_0 = arith.constant 0 : i32
    %c0_i32_1 = arith.constant 0 : i32
    return %c0_i32, %c0_i32_0 : i32, i32
  }
  func.func @transform_3(%arg0: i32) -> (i32, i32) {
    %c0_i32 = arith.constant 0 : i32
    %c0_i32_0 = arith.constant 0 : i32
    return %arg0, %c0_i32 : i32, i32
  }
}

</mosaic_0001>

<bundles_post_ra>
// kernel: generic_linear_model.1
= control target key start
LH: loop header
LB: loop body
LE: loop exit
PB: predicated region body
PF: predicated region fallthrough
CT: control target
= control target key end

     0   :  { %8 = vsyncpa [#allocation3], 0  ;;  %s409_s0 = inlined_call_operand.vmem [shape: f32[2,256], index: 0, kind: input, shape index: {}]   ;;  %s410_s1 = inlined_call_operand.vmem [shape: f32[256,128], index: 1, kind: input, shape index: {}]   ;;  %s411_s2 = inlined_call_operand.vmem [shape: f32[1,128], index: 2, kind: input, shape index: {}]   ;;  %s412_s3 = inlined_call_operand.hbm [shape: f32[2,128], index: 3, kind: output, shape index: {}]  }
   0x1   :  { %v35_v0 = vld [vmem:[%s410_s1 + $0x80] sm:$0xff]  ;;  %v36_v1 = vld [vmem:[%s410_s1 + $0x88] sm:$0xff]  ;;  %v37_v5 = vld [vmem:[%s410_s1 + $0x90] sm:$0xff] }
   0x2   :  { %v205_v2 = vpack.c.bf16 %v36_v1, %v35_v0  ;;  %v19_v3 = vld [vmem:[%s410_s1] sm:$0xff]  ;;  %v20_v4 = vld [vmem:[%s410_s1 + $0x8] sm:$0xff]  ;;  %v38_v7 = vld [vmem:[%s410_s1 + $0x98] sm:$0xff] }
   0x3   :  { %v207_v6 = vpack.c.bf16 %v20_v4, %v19_v3  ;;  %v21_v8 = vld [vmem:[%s410_s1 + $0x10] sm:$0xff]  ;;  %v22_v9 = vld [vmem:[%s410_s1 + $0x18] sm:$0xff]  ;;  %v209_v10 = vpack.c.bf16 %v38_v7, %v37_v5  ;;  %v39_v11 = vld [vmem:[%s410_s1 + $0xa0] sm:$0xff] }
   0x4   :  { %206 = vmatprep.subr.bf16.mxu0 %v205_v2  ;;  %v40_v12 = vld [vmem:[%s410_s1 + $0xa8] sm:$0xff]  ;;  %v211_v13 = vpack.c.bf16 %v22_v9, %v21_v8  ;;  %v23_v15 = vld [vmem:[%s410_s1 + $0x20] sm:$0xff]  ;;  %v41_v17 = vld [vmem:[%s410_s1 + $0xb0] sm:$0xff] }
   0x5   :  { %208 = vmatpush3.bf16.msra.mxu0 %v207_v6  ;;  %v213_v14 = vpack.c.bf16 %v40_v12, %v39_v11  ;;  %v24_v16 = vld [vmem:[%s410_s1 + $0x28] sm:$0xff]  ;;  %v42_v18 = vld [vmem:[%s410_s1 + $0xb8] sm:$0xff]  ;;  %v25_v21 = vld [vmem:[%s410_s1 + $0x30] sm:$0xff] }
   0x6   :  { %210 = vmatprep.subr.bf16.mxu0 %v209_v10  ;;  %v215_v19 = vpack.c.bf16 %v24_v16, %v23_v15  ;;  %v217_v20 = vpack.c.bf16 %v42_v18, %v41_v17  ;;  %v26_v22 = vld [vmem:[%s410_s1 + $0x38] sm:$0xff]  ;;  %v43_v23 = vld [vmem:[%s410_s1 + $0xc0] sm:$0xff]  ;;  %v44_v24 = vld [vmem:[%s410_s1 + $0xc8] sm:$0xff] }
   0x7   :  { %v219_v25 = vpack.c.bf16 %v26_v22, %v25_v21  ;;  %v243_v26 = vld.sshfl [vmem:[%s409_s0] sm:$0xff pattern:$0x76325410]  ;;  %v244_v27 = vld.sshfl [vmem:[%s409_s0 + $0x8] sm:$0xff pattern:$0x76325410]  ;;  %v221_v28 = vpack.c.bf16 %v44_v24, %v43_v23 }
   0x8   :  { %v27_v29 = vld [vmem:[%s410_s1 + $0x40] sm:$0xff]  ;;  %v28_v30 = vld [vmem:[%s410_s1 + $0x48] sm:$0xff]  ;;  %v45_v31 = vld [vmem:[%s410_s1 + $0xd0] sm:$0xff]  ;;  %v79_v34 = vcombine.high %v243_v26, %v244_v27  ;;  %v78_v51 = vcombine.low %v243_v26, %v244_v27 }
   0x9   :  { %212 = vmatpush3.bf16.msra.mxu0 %v211_v13  ;;  %v46_v32 = vld [vmem:[%s410_s1 + $0xd8] sm:$0xff]  ;;  %v223_v33 = vpack.c.bf16 %v28_v30, %v27_v29  ;;  %v29_v36 = vld [vmem:[%s410_s1 + $0x50] sm:$0xff]  ;;  %v47_v38 = vld [vmem:[%s410_s1 + $0xe0] sm:$0xff] }
   0xa   :  { %214 = vmatprep.subr.bf16.mxu0 %v213_v14  ;;  %v225_v35 = vpack.c.bf16 %v46_v32, %v45_v31  ;;  %v30_v37 = vld [vmem:[%s410_s1 + $0x58] sm:$0xff]  ;;  %v48_v39 = vld [vmem:[%s410_s1 + $0xe8] sm:$0xff]  ;;  %146 = vmatprep.mubr.f32.mxu0 %v79_v34  ;;  %v31_v42 = vld [vmem:[%s410_s1 + $0x60] sm:$0xff] }
   0xb   :  { %v227_v40 = vpack.c.bf16 %v30_v37, %v29_v36  ;;  %v229_v41 = vpack.c.bf16 %v48_v39, %v47_v38  ;;  %v32_v43 = vld [vmem:[%s410_s1 + $0x68] sm:$0xff]  ;;  %v49_v44 = vld [vmem:[%s410_s1 + $0xf0] sm:$0xff]  ;;  %v50_v45 = vld [vmem:[%s410_s1 + $0xf8] sm:$0xff] }
   0xc   :  { %v231_v46 = vpack.c.bf16 %v32_v43, %v31_v42  ;;  %v233_v47 = vpack.c.bf16 %v50_v45, %v49_v44  ;;  %v33_v48 = vld [vmem:[%s410_s1 + $0x70] sm:$0xff]  ;;  %v34_v49 = vld [vmem:[%s410_s1 + $0x78] sm:$0xff]  ;;  %v169_v53 = vld [vmem:[%s411_s2] ss:$0 sm:$0xff] }
   0xd   :  { %216 = vmatpush3.bf16.msra.mxu0 %v215_v19  ;;  %v235_v50 = vpack.c.bf16 %v34_v49, %v33_v48 }
   0xe   :  { %218 = vmatprep.subr.bf16.mxu0 %v217_v20 }
  0x11   :  { %220 = vmatpush3.bf16.msra.mxu0 %v219_v25 }
  0x12   :  { %222 = vmatprep.subr.bf16.mxu0 %v221_v28 }
  0x15   :  { %224 = vmatpush3.bf16.msra.mxu0 %v223_v33 }
  0x16   :  { %226 = vmatprep.subr.bf16.mxu0 %v225_v35 }
  0x19   :  { %228 = vmatpush3.bf16.msra.mxu0 %v227_v40 }
  0x1a   :  { %230 = vmatprep.subr.bf16.mxu0 %v229_v41 }
  0x1d   :  { %232 = vmatpush3.bf16.msra.mxu0 %v231_v46 }
  0x1e   :  { %234 = vmatprep.subr.bf16.mxu0 %v233_v47 }
  0x21   :  { %236 = vmatpush3.bf16.msra.mxu0 %v235_v50 }
  0x24   :  { %147 = vmatmul.mubr.f32.vlgmr.msra.gmra.mrb[0].mxu0 %v78_v51 }
  0xf7   :  { %v202_v52 = vpop.f32.mrb[0].mxu0 }
  0xf8   :  { %v203_v54 = vpop.f32.mrb[1].mxu0 }
  0xf9   :  { %v204_v55 = vadd.f32 %v203_v54, %v202_v52 }
  0xfb   :  { %v149_v56 = vadd.f32 %v204_v55, %v169_v53 }
  0xfd   :  { %152 = vst [vmem:[#allocation2] sm:$0xff] %v149_v56 }
  0xfe   :  { %157 = vsyncadd [#allocation3], 96  ;;  %s269_s27 = smov [#allocation2]  }
  0xff   :  { %s158_s28 = sshll.u32 %s269_s27, 4  ;;  %s159_s28 = int_to_ptr.vmem [resolvable:$true] %s158_s28 }
 0x100   :  { %s245_s1 = scalar_lea.vmem %s159_s28, 32  ;;  %s249_s29 = scalar_lea.vmem %s159_s28, 128 }
 0x101   :  { %p246_p0 = scmp.ne.s32.totalorder %s159_s28, %s245_s1  ;;  %p250_p1 = scmp.lt.s32.totalorder %s159_s28, %s159_s28 }
 0x102   :  { %p251_p2 = scmp.lt.s32.totalorder %s249_s29, %s245_s1 }
 0x104   :  { %p252_p3 = por %p251_p2, %p250_p1 }
 0x106   :  { %p253_p4 = pnand %p252_p3, %p246_p0 }
 0x108   :  { %256 = shalt.err (!%p253_p4)
}
 0x109   :  { %s257_s2 = scalar_lea.hbm %s412_s3, 32 }
 0x10a   :  { %p258_p5 = scmp.ne.s32.totalorder %s412_s3, %s257_s2  ;;  %p261_p6 = scmp.lt.u32.totalorder %s257_s2, %s412_s3 }
 0x10c   :  { %p263_p7 = pnand %p261_p6, %p258_p5 }
 0x10e   :  { %266 = shalt.err (!%p263_p7)
}
 0x10f   :  { %s270_s8 = smov 32   ;;  %s271_s9 = smov 2  }
 0x110   :  { %164 = dma.vmem_to_hbm [thread:$0]  %s159_s28, 32, %s412_s3, [#allocation3], %s270_s8, %s270_s8, %s271_s9  }
 0x111   :  { %267 = dma.done.wait [#allocation3], 128  }
 0x112   :  { %268 = vsyncadd [#allocation3], 4294967168 }
 0x113   :  { %168 = vsyncpa [#allocation3], 1 }

</bundles_post_ra>
